<compile_context>
chip_gen: v5e
topology: v5e:2x2
jax: 0.10.0
libtpu: 0.0.40
codegen_flags: <defaults>
</compile_context>

<pallas_src>
import functools

import jax
import jax.numpy as jnp
import numpy as np
from jax.experimental import pallas as pl
from jax.experimental.pallas import tpu as pltpu


def _round_up(n, m):
    return ((n + m - 1) // m) * m


def _iv_kernel(x_ref, a16_ref, a32_ref, iv_ref, *, inv_k2):
    """TM contact maps per grid step.

    x_ref  : (TM, H, W) bf16   current batch of maps (W == H)
    a16_ref: (H, Dp)   bf16    window mask (exact 0/1), MXU operand
    a32_ref: (H, Dp)   f32     same mask, VPU operand
    iv_ref : (1, TM, Dp) f32   iv[m, i] = mean of x[m, i:i+K, i:i+K] (0 in padded cols)
    """
    tm, h, w = x_ref.shape
    # Separable form of the diagonal 2-D window pool (maps batched along M):
    #   y[mh, i] = sum_w x[mh, w] * A[w, i]            (MXU, bf16 in / f32 accumulate)
    #   iv[m, i] = (1/K^2) * sum_h A[h, i] * y[m, h, i] (VPU multiply + sublane reduce)
    x2 = x_ref[...].reshape(tm * h, w)                                  # layout-preserving
    y = jnp.dot(x2, a16_ref[...], preferred_element_type=jnp.float32)  # (TM*H, Dp)
    y3 = y.reshape(tm, h, -1)                                           # (TM, H, Dp)
    iv = jnp.sum(y3 * a32_ref[...][None, :, :], axis=1) * inv_k2        # (TM, Dp)
    iv_ref[0] = iv


def _loss_kernel(iv_out_ref, iv_tar_ref, diff_ref, loss_ref, *,
                 d_valid, l_valid, inv_ds):
    """Per-tensor normalization + signed derivative pool + MSE (tiny, gridless).

    iv_out_ref, iv_tar_ref : (BC, Dp) f32  (columns >= d_valid are exactly 0)
    diff_ref               : (Dp, Lp) f32 in {-1, 0, +1} (rows >= d_valid, cols >= l_valid are 0)
    loss_ref               : (1, 1) f32
    """
    bc, dp = iv_out_ref.shape
    lane = jax.lax.broadcasted_iota(jnp.int32, (bc, dp), 1)
    valid = lane < d_valid
    inv_n = 1.0 / float(bc * d_valid)

    def lognorm(v):
        # Per-tensor global mean over VALID entries (padded columns are exactly 0, so the
        # plain sum is already correct). Approx reciprocal runs on the EUP; its tiny error
        # is a constant additive log2 offset per tensor that cancels in top - bottom.
        s = jnp.sum(v, axis=(0, 1), keepdims=True)
        m = s * inv_n
        vn = v * pl.reciprocal(m, approx=True)
        vn = jnp.where(valid, vn, 1.0)          # keep log2 finite in padded columns
        return jnp.log2(vn)

    delta = lognorm(iv_tar_ref[...]) - lognorm(iv_out_ref[...])          # (BC, Dp)
    d = jnp.dot(delta, diff_ref[...], preferred_element_type=jnp.float32) * inv_ds
    loss_ref[0, 0] = jnp.sum(d * d) * (1.0 / float(bc * l_valid))


def _build_masks(H, K, DS, Dp, Lp):
    """Compile-time constant masks (numpy, exact 0/±1), zero-padded to lane-dense widths."""
    D = H - K + 1
    L = D - 2 * DS + 1
    A = np.zeros((H, Dp), np.float32)
    hh = np.arange(H)[:, None]
    ii = np.arange(D)[None, :]
    A[:, :D] = ((hh >= ii) & (hh < ii + K)).astype(np.float32)           # (H, Dp)
    diff = np.zeros((Dp, Lp), np.float32)
    dd = np.arange(D)[:, None]
    jj = np.arange(L)[None, :]
    top = (dd >= jj + DS) & (dd < jj + 2 * DS)
    bot = (dd >= jj) & (dd < jj + DS)
    diff[:D, :L] = top.astype(np.float32) - bot.astype(np.float32)       # (Dp, Lp)
    return A, diff


def insulation_loss(output, target, window_radius=10, deriv_size=10):
    """output, target: (B, C, H, W) with H == W (square Hi-C contact maps)."""
    B, C, H, W = output.shape
    assert H == W, "InsulationLoss assumes square contact maps"
    K, DS = window_radius, deriv_size
    D = H - K + 1
    L = D - 2 * DS + 1
    assert L >= 1, "input too small for the given window/deriv sizes"
    BC = B * C
    Dp = _round_up(D, 128)
    Lp = _round_up(L, 128)

    A_np, diff_np = _build_masks(H, K, DS, Dp, Lp)
    A16 = jnp.asarray(A_np, dtype=jnp.bfloat16)   # 0/1 exact in bf16 (MXU operand)
    A32 = jnp.asarray(A_np, dtype=jnp.float32)    # VPU operand
    diff = jnp.asarray(diff_np)                   # (Dp, Lp) f32

    # Maps per grid step: largest divisor of BC that keeps the flattened matmul rows
    # <= 512 and (when possible) leaves a grid of length >= 2 so v7x's 2 TCs both work.
    TM = 1
    for cand in range(1, BC + 1):
        if BC % cand == 0 and cand * H <= 512 and BC // cand >= min(2, BC):
            TM = cand
    G = BC // TM

    cparams = pltpu.CompilerParams(
        dimension_semantics=("parallel",),
        vmem_limit_bytes=64 * 1024 * 1024,
    )
    cost = pl.CostEstimate(
        flops=int(2 * BC * H * W * Dp + 2 * BC * H * Dp),
        transcendentals=0,
        bytes_accessed=int(BC * H * W * 2 + H * Dp * 6 + BC * Dp * 4),
    )

    def per_map_iv(x4):
        # bf16 cast done outside the kernel (halves DMA bytes + per-block VMEM; in a fused
        # pipeline the upstream producer would emit bf16 directly).
        x3 = x4.reshape(BC, H, W).astype(jnp.bfloat16)
        iv3 = pl.pallas_call(
            functools.partial(_iv_kernel, inv_k2=1.0 / float(K * K)),
            out_shape=jax.ShapeDtypeStruct((G, TM, Dp), jnp.float32),
            grid=(G,),
            in_specs=[
                pl.BlockSpec((TM, H, W), lambda m: (m, 0, 0)),
                pl.BlockSpec((H, Dp), lambda m: (0, 0)),   # resident constant blocks
                pl.BlockSpec((H, Dp), lambda m: (0, 0)),
            ],
            out_specs=pl.BlockSpec((1, TM, Dp), lambda m: (m, 0, 0)),
            compiler_params=cparams,
            cost_estimate=cost,
        )(x3, A16, A32)
        return iv3.reshape(BC, Dp)                # leading-dim collapse, effectively free

    iv_out = per_map_iv(output)
    iv_tar = per_map_iv(target)

    # Phase 2: per-tensor mean/log2 normalization, top-minus-bottom pool, MSE.
    vmem = pltpu.MemorySpace.VMEM
    loss = pl.pallas_call(
        functools.partial(_loss_kernel, d_valid=D, l_valid=L, inv_ds=1.0 / float(DS)),
        out_shape=jax.ShapeDtypeStruct((1, 1), jnp.float32),
        in_specs=[pl.BlockSpec(memory_space=vmem)] * 3,
        out_specs=pl.BlockSpec(memory_space=vmem),
    )(iv_out, iv_tar, diff)
    return loss[0, 0]


def _reference_loss(output, target, K=10, DS=10):
    """Pure-JAX f32 reference mirroring the PyTorch module, for validation."""
    def indiv(x):
        B, C, H, W = x.shape
        D = H - K + 1
        iv = jnp.stack(
            [x[:, :, i:i + K, i:i + K].mean(axis=(2, 3)) for i in range(D)], axis=-1)
        iv = jnp.log2(iv / jnp.mean(iv))
        Lo = D - 2 * DS + 1
        top = jnp.stack([iv[:, :, DS + j: DS + j + DS].mean(axis=-1) for j in range(Lo)],
                        axis=-1)
        bot = jnp.stack([iv[:, :, j: j + DS].mean(axis=-1) for j in range(Lo)], axis=-1)
        return top - bot

    od, td = indiv(output), indiv(target)
    return jnp.mean((td - od) ** 2)


if __name__ == "__main__":
    # Need H >= 2*deriv_size + window_radius - 1 = 29; keep it small.
    B, C, H, W = 2, 2, 64, 64
    key = jax.random.PRNGKey(0)
    k1, k2 = jax.random.split(key)
    # Hi-C style maps: strictly positive so log2 of the normalized insulation is finite.
    output = jax.random.uniform(k1, (B, C, H, W), jnp.float32, minval=0.1, maxval=2.0)
    target = jax.random.uniform(k2, (B, C, H, W), jnp.float32, minval=0.1, maxval=2.0)

    loss = jax.block_until_ready(insulation_loss(output, target))
    ref = jax.block_until_ready(_reference_loss(output, target))

    # bf16 matmul operands (f32 accumulation) vs. the pure-f32 reference -> allow a
    # small relative deviation on the scalar loss.
    assert jnp.allclose(loss, ref, rtol=2e-2, atol=1e-6), (loss, ref)

    print("KERNEL_OK")
</pallas_src>

<mosaic_0001>
module attributes {stable_mosaic.version = 11 : i64} {
  func.func @_iv_kernel(%arg0: i32, %arg1: memref<2x64x64xbf16, #tpu.memory_space<vmem>>, %arg2: memref<64x128xbf16, #tpu.memory_space<vmem>>, %arg3: memref<64x128xf32, #tpu.memory_space<vmem>>, %arg4: memref<1x2x128xf32, #tpu.memory_space<vmem>>) attributes {dimension_semantics = [#tpu.dimension_semantics<parallel>], iteration_bounds = array<i64: 2>, scalar_prefetch = 0 : i64, scratch_operands = 0 : i64, tpu.core_type = #tpu.core_type<tc>, window_params = [{transform_indices = @transform_0, window_bounds = array<i64: 2, 64, 64>}, {pipeline_mode = #tpu.pipeline_mode<synchronous>, transform_indices = @transform_1, window_bounds = array<i64: 64, 128>}, {pipeline_mode = #tpu.pipeline_mode<synchronous>, transform_indices = @transform_2, window_bounds = array<i64: 64, 128>}, {transform_indices = @transform_3, window_bounds = array<i64: 1, 2, 128>}]} {
    %c0 = arith.constant 0 : index
    %c0_0 = arith.constant 0 : index
    %c0_1 = arith.constant 0 : index
    %0 = vector.load %arg1[%c0, %c0_0, %c0_1] : memref<2x64x64xbf16, #tpu.memory_space<vmem>>, vector<2x64x64xbf16>
    %1 = vector.shape_cast %0 : vector<2x64x64xbf16> to vector<128x64xbf16>
    %c0_2 = arith.constant 0 : index
    %c0_3 = arith.constant 0 : index
    %2 = vector.load %arg2[%c0_2, %c0_3] : memref<64x128xbf16, #tpu.memory_space<vmem>>, vector<64x128xbf16>
    %cst = arith.constant dense<0.000000e+00> : vector<128x128xf32>
    %3 = tpu.matmul %1, %2, %cst {dimension_numbers = #tpu.dot_dimension_numbers<[1], [0], [0], [1], [0, 0, 1, 1], [], []>} : vector<128x64xbf16>, vector<64x128xbf16>, vector<128x128xf32> -> vector<128x128xf32>
    %4 = vector.shape_cast %3 : vector<128x128xf32> to vector<2x64x128xf32>
    %c0_4 = arith.constant 0 : index
    %c0_5 = arith.constant 0 : index
    %5 = vector.load %arg3[%c0_4, %c0_5] : memref<64x128xf32, #tpu.memory_space<vmem>>, vector<64x128xf32>
    %6 = vector.shape_cast %5 : vector<64x128xf32> to vector<1x64x128xf32>
    %7 = vector.broadcast %6 : vector<1x64x128xf32> to vector<2x64x128xf32>
    %8 = arith.mulf %4, %7 : vector<2x64x128xf32>
    %cst_6 = arith.constant dense<0.000000e+00> : vector<2x128xf32>
    %9 = vector.multi_reduction <add>, %8, %cst_6 [1] : vector<2x64x128xf32> to vector<2x128xf32>
    %cst_7 = arith.constant 0.00999999977 : f32
    %10 = vector.broadcast %cst_7 : f32 to vector<2x128xf32>
    %11 = arith.mulf %9, %10 : vector<2x128xf32>
    %c0_8 = arith.constant 0 : index
    %c0_9 = arith.constant 0 : index
    %c0_10 = arith.constant 0 : index
    %12 = vector.load %arg4[%c0_8, %c0_9, %c0_10] : memref<1x2x128xf32, #tpu.memory_space<vmem>>, vector<1x2x128xf32>
    %13 = vector.shape_cast %12 : vector<1x2x128xf32> to vector<2x128xf32>
    %14 = vector.shape_cast %11 : vector<2x128xf32> to vector<1x2x128xf32>
    tpu.vector_store %arg4[%c0_8, %c0_9, %c0_10], %14 {strides = array<i32>} : memref<1x2x128xf32, #tpu.memory_space<vmem>>, vector<1x2x128xf32>,
    return
  }
  func.func @transform_0(%arg0: i32) -> (i32, i32, i32) {
    %c0_i32 = arith.constant 0 : i32
    %c0_i32_0 = arith.constant 0 : i32
    %c0_i32_1 = arith.constant 0 : i32
    return %arg0, %c0_i32, %c0_i32_0 : i32, i32, i32
  }
  func.func @transform_1(%arg0: i32) -> (i32, i32) {
    %c0_i32 = arith.constant 0 : i32
    %c0_i32_0 = arith.constant 0 : i32
    %c0_i32_1 = arith.constant 0 : i32
    return %c0_i32, %c0_i32_0 : i32, i32
  }
  func.func @transform_2(%arg0: i32) -> (i32, i32) {
    %c0_i32 = arith.constant 0 : i32
    %c0_i32_0 = arith.constant 0 : i32
    %c0_i32_1 = arith.constant 0 : i32
    return %c0_i32, %c0_i32_0 : i32, i32
  }
  func.func @transform_3(%arg0: i32) -> (i32, i32, i32) {
    %c0_i32 = arith.constant 0 : i32
    %c0_i32_0 = arith.constant 0 : i32
    %c0_i32_1 = arith.constant 0 : i32
    return %arg0, %c0_i32, %c0_i32_0 : i32, i32, i32
  }
}

</mosaic_0001>

<bundles_post_ra>
// kernel: tpu_custom_call.1
= control target key start
LH: loop header
LB: loop body
LE: loop exit
PB: predicated region body
PF: predicated region fallthrough
CT: control target
= control target key end

     0   :  { %8 = vsyncpa [#allocation3], 0  ;;  %s1077_s0 = inlined_call_operand.hbm [shape: bf16[4,64,64], index: 0, kind: input, shape index: {}]   ;;  %s1078_s1 = inlined_call_operand.hbm [shape: bf16[64,128], index: 1, kind: input, shape index: {}]   ;;  %s1079_s2 = inlined_call_operand.hbm [shape: f32[64,128], index: 2, kind: input, shape index: {}]   ;;  %s1080_s3 = inlined_call_operand.hbm [shape: f32[2,2,128], index: 3, kind: output, shape index: {}]  }
   0x1   :  { %10 = vsyncpa [#allocation3 + $0x1], 0 }
   0x2   :  { %11 = vsyncpa [#allocation6], 0 }
   0x3   :  { %12 = vsyncpa [#allocation4], 0 }
   0x4   :  { %14 = vsyncpa [#allocation4 + $0x1], 0  ;;  %s911_s12 = smov 0   ;;  %s913_s13 = smov 0  }
   0x5   :  { %s915_s14 = smov 0   ;;  %s917_s15 = smov 0  }
   0x6 LB: > { %s932_s16 = sadd.s32 4294967295, %s883_s15   ;;  %s552_s17 = sadd.s32 4294967294, %s883_s15   ;;  %s883_s15 = sphi %s917_s15, %s1090_s15   ;;  %s879_s14 = sphi %s915_s14, %s1089_s14   ;;  %s875_s13 = sphi %s913_s13, %s1088_s13   ;;  %s871_s12 = sphi %s911_s12, %s1087_s12  }
   0x7   : > { %p40_p0 = scmp.ne.s32.totalorder %s875_s13, %s871_s12  ;;  %p41_p1 = scmp.eq.s32.totalorder %s932_s16, 0 }
   0x8   : > { %p106_p2 = scmp.eq.s32.totalorder %s932_s16, 1  ;;  %p112_p3 = scmp.eq.s32.totalorder %s552_s17, 1 }
   0x9   : > { %p941_p4 = por %p41_p1, %p40_p0  ;;  %p553_p5 = scmp.ge.s32.totalorder %s883_s15, 1 }
   0xa   : > { %p946_p6 = por %p112_p3, %p40_p0  ;;  %p119_p7 = scmp.lt.s32.totalorder %s883_s15, 3 }
   0xb   : > { %s130_s22 = sshll.u32 %s1078_s1, 4  ;;  %s885_s24 = smov [#allocation5]   ;;  %s131_s22 = int_to_ptr.hbm [resolvable:$true] %s130_s22 }
   0xc   : > { %p954_p8 = pnand %p553_p5, %p119_p7  ;;  %s132_s25 = sshll.u32 %s885_s24, 4  ;;  %s133_s25 = int_to_ptr.vmem [resolvable:$true] %s132_s25 }
   0xd   : > { %s144_s28 = sshll.u32 %s1079_s2, 4  ;;  %s886_s29 = smov 64   ;;  %s145_s28 = int_to_ptr.hbm [resolvable:$true] %s144_s28 }
   0xe   : > { %p664_p9 = pneg %p954_p8  ;;  %s887_s30 = smov 4  }
   0xf   : > { %s888_s4 = smov [#allocation7]   ;;  %s889_s6 = smov 128  }
  0x10   : > { %p665_p10 = pnand %p664_p9, %p41_p1  ;;  %s146_s5 = sshll.u32 %s888_s4, 4  ;;  %s147_s5 = int_to_ptr.vmem [resolvable:$true] %s146_s5 }
  0x11   : > { %s890_s7 = smov 8   ;;  %s970_s8 = sadd.s32 1, %s883_s15  }
  0x12   : > { %667 = dma.hbm_to_vmem [thread:$0]  (!%p665_p10), %s131_s22, 512, %s133_s25, [#allocation6], %s886_s29, %s886_s29, %s887_s30  }
  0x13   : > { %670 = dma.hbm_to_vmem [thread:$0]  (!%p665_p10), %s145_s28, 1024, %s147_s5, [#allocation6], %s889_s6, %s889_s6, %s890_s7  }
  0x14   : > { %s24_s9 = ssub.s32 %s883_s15, %s970_s8  ;;  %s27_s10 = sadd.s32 1, %s879_s14 }
  0x15   : > { %p25_p12 = scmp.eq.s32.totalorder %s24_s9, 0  ;;  %p34_p13 = scmp.ne.s32.totalorder %s879_s14, %s875_s13 }
  0x16   : > { %p35_p0 = scmp.eq.s32.totalorder %s883_s15, 0  ;;  %p681_p7 = scmp.lt.s32.totalorder %s883_s15, 2 }
  0x17   : > { %s979_s11 = scalar_select %p25_p12, %s879_s14, %s27_s10  }
  0x18   : > { %p36_p3 = por %p35_p0, %p34_p13  ;;  %p983_p5 = por %p106_p2, %p34_p13 }
  0x19   : > { %s160_s20 = sand.u32 1, %s879_s14   ;;  %s627_s22 = sshll.u32 %s883_s15, 6 }
  0x1a   : > { %s557_s21 = sshll.u32 %s160_s20, 6  ;;  %s170_s26 = scalar_lea.hbm %s1077_s0, %s627_s22 }
  0x1b   : > { %s164_s27 = scalar_lea.vmem [#allocation2], %s557_s21  ;;  %s171_s4 = sshll.u32 %s170_s26, 4  ;;  %s172_s4 = int_to_ptr.hbm [resolvable:$true] %s171_s4 }
  0x1c   : > { %s173_s28 = sshll.u32 %s164_s27, 4  ;;  %p993_p9 = pnand %p681_p7, %p36_p3  ;;  %s174_s28 = int_to_ptr.vmem [resolvable:$true] %s173_s28 }
  0x1d   : > { %s161_s6 = scalar_lea.sflag [#allocation3], %s160_s20  ;;  %s783_s7 = sshra.s32 %s172_s4, 4  ;;  %s784_s7 = int_to_ptr.hbm [resolvable:$true] %s783_s7 }
  0x1e   : > { %s785_s9 = scalar_lea.hbm %s784_s7, 64  ;;  %p787_p10 = pneg %p993_p9 }
  0x1f   : > { %p786_p2 = scmp.ne.s32.totalorder %s784_s7, %s785_s9  ;;  %s790_s22 = scalar_lea.hbm %s1077_s0, 128 }
  0x20   : > { %p791_p0 = scmp.lt.s32.totalorder %s784_s7, %s1077_s0  ;;  %p792_p3 = scmp.lt.s32.totalorder %s790_s22, %s785_s9 }
  0x21   : > { %p788_p12 = pnand %p787_p10, %p786_p2 }
  0x22   : > { %p793_p7 = por %p792_p3, %p791_p0 }
  0x23   : > { %p789_p13 = pneg %p788_p12 }
  0x25   : > { %p794_p11 = pnand %p793_p7, %p789_p13 }
  0x27   : > { %797 = shalt.err (!%p794_p11)
}
  0x28   : > { %674 = dma.hbm_to_vmem [thread:$0]  (!%p993_p9), %s172_s4, 1024, %s174_s28, %s161_s6, %s886_s29, %s886_s29, %s887_s30  }
  0x29   : > { %185 = sbr.rel (%p954_p8) target bundleno = 251 (0xfb), region = 32  ;;  %s1013_s20 = sand.u32 (!%p954_p8), 1, %s875_s13  }
  0x2a   : > { %s562_s26 = sshll.u32 (!%p954_p8), %s1013_s20, 6  ;;  %s188_s27 = scalar_lea.sflag (!%p954_p8), [#allocation3], %s1013_s20 }
  0x2b   : > { %s1017_s7 = scalar_lea.vmem (!%p954_p8), [#allocation2], %s562_s26 }
  0x2e   : > { %858 = dma.done.wait (%p941_p4), %s188_s27, 1024  }
  0x2f   : > { %860 = vsyncadd (%p941_p4), %s188_s27, 4294966272 }
  0x30   : > { %862 = dma.done.wait (%p41_p1), [#allocation6], 1536  }
  0x31   : > { %864 = vsyncadd (%p41_p1), [#allocation6], 4294965760  ;;  %v639_v0 = vld [vmem:[#allocation5 + $0x18] sm:$0xff]  ;;  %v638_v1 = vld [vmem:[#allocation5 + $0x10] sm:$0xff]  ;;  %vm315_vm0 = vcmask 523264   ;;  %s565_s18 = sshll.u32 %s1013_s20, 1 }
  0x32   : > { %344 = vmatpush.bf16.msra.mxu0 %v639_v0  ;;  %641 = vmatpush.bf16.msra.mxu2 %v639_v0  ;;  %v637_v2 = vld [vmem:[#allocation5 + $0x8] sm:$0xff]  ;;  %v636_v3 = vld [vmem:[#allocation5] sm:$0xff]  ;;  %v634_v6 = vld [vmem:[%s1017_s7 + $0x30] sm:$0xff]  ;;  %s623_s23 = sshll.u32 %s932_s16, 1  ;;  %s224_s4 = scalar_lea.vmem [#allocation8], %s565_s18  ;;  %vm443_vm1 = vcmask 1041409  }
  0x33   : > { %642 = vmatpush.bf16.msra.mxu3 %v639_v0  ;;  %640 = vmatpush.bf16.msra.mxu1 %v639_v0  ;;  %v628_v4 = vld [vmem:[%s1017_s7] sm:$0xff]  ;;  %v630_v7 = vld [vmem:[%s1017_s7 + $0x10] sm:$0xff]  ;;  %v629_v8 = vld [vmem:[%s1017_s7 + $0x8] sm:$0xff]  ;;  %s458_s28 = scalar_lea.hbm %s1080_s3, %s623_s23  ;;  %s460_s5 = sshll.u32 %s224_s4, 4  ;;  %s461_s5 = int_to_ptr.vmem [resolvable:$true] %s460_s5 }
  0x34   : > { %v632_v5 = vld [vmem:[%s1017_s7 + $0x20] sm:$0xff]  ;;  %v633_v9 = vld [vmem:[%s1017_s7 + $0x28] sm:$0xff]  ;;  %v635_v10 = vld [vmem:[%s1017_s7 + $0x38] sm:$0xff]  ;;  %s462_s6 = sshll.u32 %s458_s28, 4  ;;  %s448_s16 = scalar_lea.sflag [#allocation4], %s1013_s20  ;;  %s463_s6 = int_to_ptr.hbm [resolvable:$true] %s462_s6 }
  0x35   : > { %v631_v11 = vld [vmem:[%s1017_s7 + $0x18] sm:$0xff]  ;;  %v390_v19 = vld [vmem:[#allocation7 + $0x8] sm:$0xff]  ;;  %v389_v22 = vld [vmem:[#allocation7] sm:$0xff]  ;;  %s827_s9 = sshra.s32 %s463_s6, 4  ;;  %s833_s24 = scalar_lea.hbm %s1080_s3, 4  ;;  %s828_s9 = int_to_ptr.hbm [resolvable:$true] %s827_s9 }
  0x36   : > { %345 = vmatpush.bf16.msra.mxu0 %v638_v1  ;;  %644 = vmatpush.bf16.msra.mxu2 %v638_v1  ;;  %v391_v23 = vld [vmem:[#allocation7 + $0x10] sm:$0xff]  ;;  %v392_v29 = vld [vmem:[#allocation7 + $0x18] sm:$0xff]  ;;  %v393_v31 = vld [vmem:[#allocation7 + $0x20] sm:$0xff]  ;;  %s829_s10 = scalar_lea.hbm %s828_s9, 2  ;;  %p834_p11 = scmp.lt.s32.totalorder %s828_s9, %s1080_s3 }
  0x37   : > { %645 = vmatpush.bf16.msra.mxu3 %v638_v1  ;;  %643 = vmatpush.bf16.msra.mxu1 %v638_v1  ;;  %v394_v36 = vld [vmem:[#allocation7 + $0x28] sm:$0xff]  ;;  %v395_v37 = vld [vmem:[#allocation7 + $0x30] sm:$0xff]  ;;  %v396_v48 = vld [vmem:[#allocation7 + $0x38] sm:$0xff]  ;;  %p830_p1 = scmp.ne.s32.totalorder %s828_s9, %s829_s10  ;;  %p835_p9 = scmp.lt.s32.totalorder %s833_s24, %s829_s10 }
  0x39   : > { %p831_p4 = pnand %p830_p1, %p983_p5  ;;  %p836_p2 = por %p835_p9, %p834_p11 }
  0x3a   : > { %346 = vmatpush.bf16.msra.mxu0 %v637_v2  ;;  %647 = vmatpush.bf16.msra.mxu2 %v637_v2 }
  0x3b   : > { %648 = vmatpush.bf16.msra.mxu3 %v637_v2  ;;  %646 = vmatpush.bf16.msra.mxu1 %v637_v2  ;;  %p832_p8 = pneg %p831_p4 }
  0x3d   : > { %p837_p10 = pnand %p836_p2, %p832_p8 }
  0x3e   : > { %347 = vmatpush.bf16.msra.mxu0 %v636_v3  ;;  %650 = vmatpush.bf16.msra.mxu2 %v636_v3 }
  0x3f   : > { %651 = vmatpush.bf16.msra.mxu3 %v636_v3  ;;  %649 = vmatpush.bf16.msra.mxu1 %v636_v3 }
  0x41   : > { %614 = vmatmul.msk.bf16.vlgmr.msra.gmra.mxu0 %vm315_vm0, %v628_v4  ;;  %618 = vmatmul.msk.bf16.vlgmr.msra.gmra.mxu2 %vm315_vm0, %v632_v5 }
  0x42   : > { %620 = vmatmul.msk.bf16.vlgmr.msra.gmra.mxu3 %vm315_vm0, %v634_v6  ;;  %616 = vmatmul.msk.bf16.vlgmr.msra.gmra.mxu1 %vm315_vm0, %v630_v7 }
  0x51   : > { %615 = vmatmul.msk.bf16.gmra.mxu0 %vm315_vm0, %v629_v8  ;;  %619 = vmatmul.msk.bf16.gmra.mxu2 %vm315_vm0, %v633_v9 }
  0x52   : > { %621 = vmatmul.msk.bf16.gmra.mxu3 %vm315_vm0, %v635_v10  ;;  %617 = vmatmul.msk.bf16.gmra.mxu1 %vm315_vm0, %v631_v11 }
  0xbe   : > { %v349_v12 = vpop.f32.mrf.mxu0 }
  0xbf   : > { %v359_v13 = vpop.f32.mrf.mxu1  ;;  %v397_v26 = vmul.f32 %v389_v22, %v349_v12 }
  0xc0   : > { %v401_v39 = vmul.f32 %v393_v31, %v359_v13 }
  0xc4   : > { %v369_v14 = vpop.f32.mrf.mxu2 }
  0xc5   : > { %v379_v15 = vpop.f32.mrf.mxu3  ;;  %v405_v40 = vmul.f32 %v389_v22, %v369_v14 }
  0xc6   : > { %v351_v16 = vpop.f32.mrf.mxu0  ;;  %v409_v53 = vmul.f32 %v393_v31, %v379_v15 }
  0xc7   : > { %v361_v17 = vpop.f32.mrf.mxu1  ;;  %v398_v24 = vmul.f32 %v390_v19, %v351_v16 }
  0xc8   : > { %v402_v43 = vmul.f32 %v394_v36, %v361_v17 }
  0xc9   : > { %v413_v30 = vadd.f32 %v398_v24, %v397_v26 }
  0xcc   : > { %v371_v18 = vpop.f32.mrf.mxu2 }
  0xcd   : > { %v381_v20 = vpop.f32.mrf.mxu3  ;;  %v406_v33 = vmul.f32 %v390_v19, %v371_v18 }
  0xce   : > { %v354_v21 = vpop.f32.mrf.mxu0  ;;  %v410_v57 = vmul.f32 %v394_v36, %v381_v20 }
  0xcf   : > { %v364_v25 = vpop.f32.mrf.mxu1  ;;  %v399_v27 = vmul.f32 %v391_v23, %v354_v21  ;;  %v426_v44 = vadd.f32 %v406_v33, %v405_v40 }
  0xd0   : > { %v403_v45 = vmul.f32 %v395_v37, %v364_v25 }
  0xd1   : > { %v414_v34 = vadd.f32 %v413_v30, %v399_v27 }
  0xd4   : > { %v374_v28 = vpop.f32.mrf.mxu2 }
  0xd5   : > { %v384_v38 = vpop.f32.mrf.mxu3  ;;  %v407_v41 = vmul.f32 %v391_v23, %v374_v28 }
  0xd6   : > { %v356_v32 = vpop.f32.mrf.mxu0  ;;  %v411_v61 = vmul.f32 %v395_v37, %v384_v38 }
  0xd7   : > { %v400_v35 = vmul.f32 %v392_v29, %v356_v32  ;;  %v366_v47 = vpop.f32.mrf.mxu1  ;;  %v427_v50 = vadd.f32 %v426_v44, %v407_v41 }
  0xd8   : > { %v404_v54 = vmul.f32 %v396_v48, %v366_v47 }
  0xd9   : > { %v415_v42 = vadd.f32 %v414_v34, %v400_v35 }
  0xdb   : > { %v416_v46 = vadd.f32 %v415_v42, %v401_v39 }
  0xdc   : > { %v376_v49 = vpop.f32.mrf.mxu2 }
  0xdd   : > { %v417_v51 = vadd.f32 %v416_v46, %v402_v43  ;;  %v408_v52 = vmul.f32 %v392_v29, %v376_v49  ;;  %v386_v60 = vpop.f32.mrf.mxu3 }
  0xde   : > { %v412_v1 = vmul.f32 %v396_v48, %v386_v60 }
  0xdf   : > { %v418_v55 = vadd.f32 %v417_v51, %v403_v45  ;;  %v428_v56 = vadd.f32 %v427_v50, %v408_v52 }
  0xe1   : > { %v419_v58 = vadd.f32 %v418_v55, %v404_v54  ;;  %v429_v59 = vadd.f32 %v428_v56, %v409_v53 }
  0xe3   : > { %v420_v62 = vrot.slane %v419_v58, 4  ;;  %v430_v63 = vadd.f32 %v429_v59, %v410_v57 }
  0xe5   : > { %v421_v0 = vadd.f32 %v420_v62, %v419_v58  ;;  %v431_v2 = vadd.f32 %v430_v63, %v411_v61 }
  0xe7   : > { %v422_v3 = vrot.slane %v421_v0, 2  ;;  %v432_v4 = vadd.f32 %v431_v2, %v412_v1 }
  0xe9   : > { %v423_v5 = vadd.f32 %v422_v3, %v421_v0  ;;  %v433_v6 = vrot.slane %v432_v4, 4 }
  0xeb   : > { %v434_v7 = vadd.f32 %v433_v6, %v432_v4  ;;  %v424_v8 = vrot.slane %v423_v5, 1 }
  0xed   : > { %v435_v9 = vrot.slane %v434_v7, 2  ;;  %v425_v11 = vadd.f32 %v424_v8, %v423_v5 }
  0xef   : > { %v436_v10 = vadd.f32 %v435_v9, %v434_v7  ;;  %v439_v14 = vmul.f32 0.01, %v425_v11 }
  0xf1   : > { %v437_v12 = vrot.slane %v436_v10, 1 }
  0xf3   : > { %v438_v13 = vadd.f32 %v437_v12, %v436_v10 }
  0xf5   : > { %v440_v15 = vmul.f32 0.01, %v438_v13 }
  0xf7   : > { %v444_v16 = vsel %vm443_vm1, %v440_v15, %v439_v14 }
  0xf8   : > { %446 = vst [vmem:[%s224_s4] sm:$0x3] %v444_v16 }
  0xf9   : > { %840 = shalt.err (!%p837_p10)
}
  0xfa   : > { %662 = dma.vmem_to_hbm [thread:$0]  (%p983_p5), %s461_s5, 32, %s463_s6, %s448_s16  }
  0xfb PF: > { %s474_s20 = sand.u32 1, %s871_s12   ;;  %p1086_p12 = scmp.ge.s32.totalorder %s883_s15, 2 }
  0xfc   : > { %s475_s27 = scalar_lea.sflag [#allocation4], %s474_s20 }
  0xfd   : > { %p676_p13 = pnand %p1086_p12, %p946_p6 }
  0xff   : > { %p677_p0 = pneg %p676_p13 }
 0x101   : > { %866 = dma.done.wait (%p677_p0), %s475_s27, 32  }
 0x102   : > { %868 = vsyncadd (%p677_p0), %s475_s27, 4294967264  ;;  %p17_p3 = scmp.ge.s32.totalorder %s970_s8, 4   ;;  %s1087_s12 = smov %s875_s13 }
 0x103   : > { %s1088_s13 = smov %s879_s14  ;;  %s1089_s14 = smov %s979_s11 }
 0x104   : > { %s1090_s15 = smov %s970_s8  ;;  %19 = sbr.rel (!%p17_p3) target bundleno = 6 (0x6), region = 85 }
 0x109   :  { %481 = vsyncpa [#allocation3], 1 }
 0x10a   :  { %483 = vsyncpa [#allocation3 + $0x1], 1 }
 0x10b   :  { %484 = vsyncpa [#allocation6], 1 }
 0x10c   :  { %485 = vsyncpa [#allocation4], 1 }
 0x10d   :  { %487 = vsyncpa [#allocation4 + $0x1], 1 }

</bundles_post_ra>
